<compile_context>
chip_gen: v5e
topology: v5e:2x2
jax: 0.10.0
libtpu: 0.0.40
codegen_flags: <defaults>
</compile_context>

<pallas_src>
import jax
import jax.numpy as jnp
from jax.experimental import pallas as pl
from jax.experimental.pallas import tpu as pltpu

SEQ_LEN = 9  # hard-coded in the PyTorch forward


def _add_pos_kernel(x_ref, e_ref, o_ref):
    # x_ref: (tb, tc), e_ref: (1, tc) broadcast over rows, o_ref: (tb, tc).
    # Single VPU add in native dtype -> pure HBM-bandwidth-bound streaming kernel.
    o_ref[...] = x_ref[...] + e_ref[...]


def _sublane(itemsize: int) -> int:
    # Native sublane packing: 8 rows for 4-byte, 16 for 2-byte, 32 for 1-byte dtypes.
    return max(8, 32 // max(1, itemsize))


def _choose_tiles(B: int, C: int, itemsize: int, target_bytes: int = 4 * 1024 * 1024):
    """Pick lane-dense blocks of ~<=4 MiB. Caller guarantees C % 128 == 0."""
    sub = _sublane(itemsize)

    # Second-to-last block dim must be a multiple of the sublane count or the full extent.
    tb = sub if B % sub == 0 else B

    # Last block dim: multiple of 128, as large as the byte budget allows.
    max_cols = max(128, ((target_bytes // (tb * itemsize)) // 128) * 128)
    tc = min(C, max_cols)

    if B % sub == 0:
        max_rows = max(sub, ((target_bytes // (tc * itemsize)) // sub) * sub)
        tb = min(B, max_rows)

    # Guarantee >= 2 blocks on the (parallel) C axis so v7x's second TensorCore
    # gets work even for tiny B. Negligible extra-step cost on 1-TC chips.
    if tb >= B and tc >= C and C % 256 == 0:
        tc = (C // 2 // 128) * 128

    return tb, tc


def learned_bb2d_encoding(
    x: jax.Array,
    emb_table: jax.Array,
    *,
    min_pallas_bytes: int = 2 * 1024 * 1024,
) -> jax.Array:
    """x: (B, S, N, D), emb_table: (S, D) -> (B, S, N, D)."""
    B, S, N, D = x.shape
    assert S == SEQ_LEN, f"forward hard-codes seq_len={SEQ_LEN}, got {S}"
    assert emb_table.shape == (S, D)

    # --- hoisted, computed once: nn.Embedding(max_norm=1.0) row renorm ---------
    # torch: scale = max_norm / (norm + 1e-7) applied only when norm > max_norm.
    emb_f32 = emb_table.astype(jnp.float32)
    norm = jnp.sqrt(jnp.sum(emb_f32 * emb_f32, axis=-1, keepdims=True))   # (S, 1)
    scale = jnp.where(norm > 1.0, 1.0 / (norm + 1e-7), 1.0)
    emb = (emb_f32 * scale).astype(x.dtype)                               # (S, D)

    C = S * N * D
    itemsize = x.dtype.itemsize
    total_bytes = B * C * itemsize

    # Tiny inputs (launch overhead dominates, fusion lost) or non-lane-aligned C
    # (would force a degenerate full-array block): plain XLA add.
    if total_bytes < min_pallas_bytes or C % 128 != 0:
        return x + emb[None, :, None, :]

    # Pre-broadcast to the flattened, lane-dense per-batch row pattern: (1, S*N*D).
    emb_row = jnp.broadcast_to(emb[:, None, :], (S, N, D)).reshape(1, C)
    x2 = x.reshape(B, C)

    tb, tc = _choose_tiles(B, C, itemsize)
    # Column (C) axis OUTER, batch axis INNER: emb_row's block index is constant
    # across inner steps -> not re-DMA'd every grid step.
    grid = (pl.cdiv(C, tc), pl.cdiv(B, tb))

    # Double-buffered x + out blocks plus double-buffered emb row, with headroom.
    required_vmem = (2 * 2 * tb * tc + 2 * tc) * itemsize
    vmem_limit = int(max(required_vmem + (2 << 20), 16 << 20))

    out2 = pl.pallas_call(
        _add_pos_kernel,
        out_shape=jax.ShapeDtypeStruct((B, C), x.dtype),
        grid_spec=pltpu.PrefetchScalarGridSpec(
            num_scalar_prefetch=0,
            grid=grid,
            in_specs=[
                pl.BlockSpec((tb, tc), lambda j, i: (i, j)),
                pl.BlockSpec((1, tc), lambda j, i: (0, j)),
            ],
            out_specs=pl.BlockSpec((tb, tc), lambda j, i: (i, j)),
        ),
        compiler_params=pltpu.CompilerParams(
            dimension_semantics=("parallel", "arbitrary"),
            vmem_limit_bytes=vmem_limit,
        ),
    )(x2, emb_row)

    return out2.reshape(B, S, N, D)


def reference(x, emb_table):
    emb_f32 = emb_table.astype(jnp.float32)
    norm = jnp.sqrt(jnp.sum(emb_f32 * emb_f32, axis=-1, keepdims=True))
    scale = jnp.where(norm > 1.0, 1.0 / (norm + 1e-7), 1.0)
    emb = (emb_f32 * scale).astype(x.dtype)
    return x + emb[None, :, None, :]


if __name__ == "__main__":
    key = jax.random.PRNGKey(0)
    k_x, k_emb, k_x2, k_emb2 = jax.random.split(key, 4)

    # Shape 1: the module's natural small shape (B=2, seq=9, tokens=16, d_model=32).
    B, S, N, D = 2, SEQ_LEN, 16, 32
    x = jax.random.normal(k_x, (B, S, N, D), dtype=jnp.float32)
    emb_table = jax.random.normal(k_emb, (S, D), dtype=jnp.float32)  # nn.Embedding init: N(0,1)

    # min_pallas_bytes=0 forces the Pallas path so the kernel itself is exercised
    # even at this tiny test shape (prod default would route it to plain XLA).
    out = learned_bb2d_encoding(x, emb_table, min_pallas_bytes=0)
    out = jax.block_until_ready(out)
    ref = reference(x, emb_table)
    assert out.shape == (B, S, N, D)
    assert jnp.allclose(out, ref, atol=1e-5, rtol=1e-5), "mismatch vs reference (shape 1)"

    # Shape 2: sublane-aligned batch path (B=8), still small.
    B2, N2, D2 = 8, 16, 64
    x2 = jax.random.normal(k_x2, (B2, SEQ_LEN, N2, D2), dtype=jnp.float32)
    emb_table2 = jax.random.normal(k_emb2, (SEQ_LEN, D2), dtype=jnp.float32)
    out2 = learned_bb2d_encoding(x2, emb_table2, min_pallas_bytes=0)
    out2 = jax.block_until_ready(out2)
    ref2 = reference(x2, emb_table2)
    assert jnp.allclose(out2, ref2, atol=1e-5, rtol=1e-5), "mismatch vs reference (shape 2)"

    print("KERNEL_OK")
</pallas_src>

<mosaic_0001>
module attributes {stable_mosaic.version = 11 : i64} {
  func.func @_add_pos_kernel(%arg0: i32, %arg1: i32, %arg2: memref<2x2304xf32, #tpu.memory_space<vmem>>, %arg3: memref<1x2304xf32, #tpu.memory_space<vmem>>, %arg4: memref<2x2304xf32, #tpu.memory_space<vmem>>) attributes {dimension_semantics = [#tpu.dimension_semantics<parallel>, #tpu.dimension_semantics<arbitrary>], iteration_bounds = array<i64: 2, 1>, scalar_prefetch = 0 : i64, scratch_operands = 0 : i64, tpu.core_type = #tpu.core_type<tc>, window_params = [{transform_indices = @transform_0, window_bounds = array<i64: 2, 2304>}, {transform_indices = @transform_1, window_bounds = array<i64: 1, 2304>}, {transform_indices = @transform_2, window_bounds = array<i64: 2, 2304>}]} {
    %c0 = arith.constant 0 : index
    %c0_0 = arith.constant 0 : index
    %0 = vector.load %arg2[%c0, %c0_0] : memref<2x2304xf32, #tpu.memory_space<vmem>>, vector<2x2304xf32>
    %c0_1 = arith.constant 0 : index
    %c0_2 = arith.constant 0 : index
    %1 = vector.load %arg3[%c0_1, %c0_2] : memref<1x2304xf32, #tpu.memory_space<vmem>>, vector<1x2304xf32>
    %2 = vector.broadcast %1 : vector<1x2304xf32> to vector<2x2304xf32>
    %3 = arith.addf %0, %2 : vector<2x2304xf32>
    %c0_3 = arith.constant 0 : index
    %c0_4 = arith.constant 0 : index
    %4 = vector.load %arg4[%c0_3, %c0_4] : memref<2x2304xf32, #tpu.memory_space<vmem>>, vector<2x2304xf32>
    tpu.vector_store %arg4[%c0_3, %c0_4], %3 {strides = array<i32>} : memref<2x2304xf32, #tpu.memory_space<vmem>>, vector<2x2304xf32>,
    return
  }
  func.func @transform_0(%arg0: i32, %arg1: i32) -> (i32, i32) {
    %c0_i32 = arith.constant 0 : i32
    return %arg1, %arg0 : i32, i32
  }
  func.func @transform_1(%arg0: i32, %arg1: i32) -> (i32, i32) {
    %c0_i32 = arith.constant 0 : i32
    %c0_i32_0 = arith.constant 0 : i32
    return %c0_i32, %arg0 : i32, i32
  }
  func.func @transform_2(%arg0: i32, %arg1: i32) -> (i32, i32) {
    %c0_i32 = arith.constant 0 : i32
    return %arg1, %arg0 : i32, i32
  }
}

</mosaic_0001>

<bundles_post_ra>
// kernel: tpu_custom_call.1
= control target key start
LH: loop header
LB: loop body
LE: loop exit
PB: predicated region body
PF: predicated region fallthrough
CT: control target
= control target key end

     0   :  { %7 = vsyncpa [#allocation3], 0  ;;  %s833_s0 = inlined_call_operand.hbm [shape: f32[2,4608], index: 0, kind: input, shape index: {}]   ;;  %s834_s1 = inlined_call_operand.hbm [shape: f32[1,4608], index: 1, kind: input, shape index: {}]   ;;  %s835_s2 = inlined_call_operand.hbm [shape: f32[2,4608], index: 2, kind: output, shape index: {}]  }
   0x1   :  { %9 = vsyncpa [#allocation3 + $0x1], 0 }
   0x2   :  { %10 = vsyncpa [#allocation6], 0 }
   0x3   :  { %12 = vsyncpa [#allocation6 + $0x1], 0 }
   0x4   :  { %13 = vsyncpa [#allocation4], 0 }
   0x5   :  { %15 = vsyncpa [#allocation4 + $0x1], 0  ;;  %s666_s9 = smov 0   ;;  %s668_s10 = smov 0  }
   0x6   :  { %s670_s11 = smov 0   ;;  %s672_s12 = smov 0  }
   0x7   :  { %s674_s13 = smov 0   ;;  %s676_s14 = smov 0  }
   0x8 LB: > { %s421_s15 = sadd.s32 4294967295, %s649_s14   ;;  %s422_s16 = sadd.s32 4294967294, %s649_s14   ;;  %s649_s14 = sphi %s676_s14, %s21_s14   ;;  %s645_s13 = sphi %s674_s13, %s845_s13   ;;  %s641_s12 = sphi %s672_s12, %s844_s12   ;;  %s637_s11 = sphi %s670_s11, %s843_s11   ;;  %s633_s10 = sphi %s668_s10, %s842_s10   ;;  %s629_s9 = sphi %s666_s9, %s841_s9  }
   0x9   : > { %s33_s17 = sadd.s32 1, %s645_s13  ;;  %s42_s18 = sadd.s32 1, %s637_s11 }
   0xa   : > { %p35_p0 = scmp.ge.s32.totalorder %s33_s17, 2  ;;  %p49_p1 = scmp.ne.s32.totalorder %s637_s11, %s633_s10 }
   0xb   : > { %p50_p2 = scmp.eq.s32.totalorder %s649_s14, 0  ;;  %p55_p3 = scmp.ne.s32.totalorder %s633_s10, %s629_s9 }
   0xc   : > { %s847_s17 = smov (%p35_p0, %s33_s17), 0  ;;  %p56_p5 = scmp.eq.s32.totalorder %s421_s15, 0 }
   0xd   : > { %p707_p4 = por %p50_p2, %p49_p1  ;;  %s38_s20 = ssub.s32 %s645_s13, %s847_s17 }
   0xe   : > { %p107_p6 = scmp.eq.s32.totalorder %s421_s15, 1  ;;  %p40_p7 = scmp.eq.s32.totalorder %s38_s20, 0 }
   0xf   : > { %p713_p8 = por %p56_p5, %p55_p3  ;;  %p113_p10 = scmp.eq.s32.totalorder %s422_s16, 1 }
  0x10   : > { %p717_p9 = por %p107_p6, %p49_p1  ;;  %p424_p12 = scmp.ge.s32.totalorder %s649_s14, 2 }
  0x11   : > { %s722_s23 = scalar_select %p40_p7, %s637_s11, %s42_s18  }
  0x12   : > { %p724_p11 = por %p113_p10, %p55_p3  ;;  %p453_p13 = scmp.lt.s32.totalorder %s649_s14, 2 }
  0x13   : > { %s133_s25 = sand.u32 1, %s637_s11   ;;  %s430_s27 = smul.u32 36, %s645_s13 }
  0x14   : > { %s432_s26 = smul.u32 36, %s133_s25  ;;  %p734_p0 = pnand %p453_p13, %p707_p4 }
  0x15   : > { %p426_p1 = scmp.ge.s32.totalorder %s649_s14, 1  ;;  %s144_s3 = scalar_lea.hbm %s833_s0, %s430_s27 }
  0x16   : > { %s137_s4 = scalar_lea.vmem [#allocation2], %s432_s26  ;;  %s146_s6 = sshll.u32 %s144_s3, 4  ;;  %s147_s6 = int_to_ptr.hbm [resolvable:$true] %s146_s6 }
  0x17   : > { %s148_s5 = sshll.u32 %s137_s4, 4  ;;  %s134_s7 = scalar_lea.sflag [#allocation3], %s133_s25  ;;  %s149_s5 = int_to_ptr.vmem [resolvable:$true] %s148_s5 }
  0x18   : > { %445 = dma.hbm_to_vmem [thread:$0]  (!%p734_p0), %s147_s6, 576, %s149_s5, %s134_s7  }
  0x19   : > { %p172_p2 = scmp.lt.s32.totalorder %s649_s14, 3  ;;  %s433_s8 = smul.u32 18, %s133_s25 }
  0x1a   : > { %s160_s15 = smul.u32 18, %s645_s13  ;;  %s156_s26 = scalar_lea.sflag [#allocation6], %s133_s25 }
  0x1b   : > { %p173_p3 = pnand %p426_p1, %p172_p2  ;;  %s159_s20 = scalar_lea.vmem [#allocation5], %s433_s8 }
  0x1c   : > { %s163_s19 = scalar_lea.hbm %s834_s1, %s160_s15  ;;  %s167_s29 = sshll.u32 %s159_s20, 4  ;;  %s168_s29 = int_to_ptr.vmem [resolvable:$true] %s167_s29 }
  0x1d   : > { %s165_s27 = sshll.u32 %s163_s19, 4  ;;  %176 = sbr.rel (%p173_p3) target bundleno = 61 (0x3d), region = 28  ;;  %s166_s27 = int_to_ptr.hbm [resolvable:$true] %s165_s27 }
  0x1e   : > { %448 = dma.hbm_to_vmem [thread:$0]  (!%p734_p0), %s166_s27, 288, %s168_s29, %s156_s26  }
  0x1f   : > { %s752_s30 = sand.u32 (!%p173_p3), 1, %s633_s10  }
  0x20   : > { %s434_s3 = smul.u32 (!%p173_p3), 36, %s752_s30  ;;  %s179_s4 = scalar_lea.sflag (!%p173_p3), [#allocation3], %s752_s30 }
  0x22   : > { %s758_s5 = scalar_lea.vmem [#allocation2], %s434_s3 }
  0x23   : > { %616 = dma.done.wait (%p713_p8), %s179_s4, 576  }
  0x24   : > { %618 = vsyncadd (%p713_p8), %s179_s4, 4294966720  ;;  %s435_s25 = smul.u32 18, %s752_s30  ;;  %s189_s28 = scalar_lea.sflag [#allocation6], %s752_s30 }
  0x26   : > { %s766_s6 = scalar_lea.vmem [#allocation5], %s435_s25 }
  0x27   : > { %620 = dma.done.wait (%p713_p8), %s189_s28, 288  }
  0x28   : > { %622 = vsyncadd (%p713_p8), %s189_s28, 4294967008  ;;  %v227_v0 = vld [vmem:[%s766_s6] sm:$0xff]  ;;  %vm264_vm0 = vcmask 1041408   ;;  %vm266_vm1 = vcmask 1045508   ;;  %vm268_vm2 = vcmask 1043456   ;;  %v228_v5 = vld [vmem:[%s766_s6 + $0x8] sm:$0xff] }
  0x29   : > { %v233_v1 = vperm.slane %v227_v0, 0  ;;  %v234_v2 = vperm.slane %v227_v0, 1  ;;  %v235_v3 = vperm.slane %v227_v0, 2  ;;  %v236_v4 = vperm.slane %v227_v0, 3  ;;  %v222_v14 = vld [vmem:[%s758_s5] sm:$0xff]  ;;  %v223_v21 = vld [vmem:[%s758_s5 + $0x8] sm:$0xff] }
  0x2a   : > { %v237_v6 = vperm.slane %v227_v0, 4  ;;  %v238_v7 = vperm.slane %v227_v0, 5  ;;  %v239_v8 = vperm.slane %v227_v0, 6  ;;  %v240_v9 = vperm.slane %v227_v0, 7  ;;  %s431_s21 = smul.u32 36, %s641_s12  ;;  %v224_v34 = vld [vmem:[%s758_s5 + $0x10] sm:$0xff] }
  0x2b   : > { %v251_v10 = vrot.slane %v234_v2, 6  ;;  %v252_v11 = vrot.slane %v235_v3, 4  ;;  %v253_v12 = vrot.slane %v236_v4, 2  ;;  %v241_v13 = vperm.slane %v228_v5, 0  ;;  %v229_v32 = vld [vmem:[%s766_s6 + $0x10] sm:$0x3] }
  0x2c   : > { %v254_v15 = vrot.slane %v238_v7, 6  ;;  %v255_v16 = vrot.slane %v239_v8, 4  ;;  %v256_v17 = vrot.slane %v240_v9, 2  ;;  %v242_v18 = vperm.slane %v228_v5, 1  ;;  %s218_s7 = scalar_lea.vmem [#allocation7], %s434_s3  ;;  %s309_s15 = scalar_lea.hbm %s835_s2, %s431_s21  ;;  %v225_v48 = vld [vmem:[%s758_s5 + $0x18] sm:$0xff] }
  0x2d   : > { %v265_v19 = vsel %vm264_vm0, %v233_v1, %v251_v10  ;;  %v267_v20 = vsel %vm266_vm1, %v252_v11, %v253_v12  ;;  %v243_v22 = vperm.slane %v228_v5, 2  ;;  %v244_v23 = vperm.slane %v228_v5, 3  ;;  %v226_v50 = vld [vmem:[%s758_s5 + $0x20] sm:$0xf]  ;;  %s311_s16 = sshll.u32 %s218_s7, 4  ;;  %s313_s18 = sshll.u32 %s309_s15, 4  ;;  %s312_s16 = int_to_ptr.vmem [resolvable:$true] %s311_s16  ;;  %s314_s18 = int_to_ptr.hbm [resolvable:$true] %s313_s18 }
  0x2e   : > { %v269_v24 = vsel %vm268_vm2, %v265_v19, %v267_v20  ;;  %v270_v25 = vsel %vm264_vm0, %v237_v6, %v254_v15  ;;  %v271_v26 = vsel %vm266_vm1, %v255_v16, %v256_v17  ;;  %v257_v27 = vrot.slane %v242_v18, 6  ;;  %s296_s19 = scalar_lea.sflag [#allocation4], %s752_s30  ;;  %s577_s20 = sshra.s32 %s314_s18, 4  ;;  %s578_s20 = int_to_ptr.hbm [resolvable:$true] %s577_s20 }
  0x2f   : > { %v285_v28 = vadd.f32 %v269_v24, %v222_v14  ;;  %v272_v29 = vsel %vm268_vm2, %v270_v25, %v271_v26  ;;  %v258_v30 = vrot.slane %v243_v22, 4  ;;  %v259_v31 = vrot.slane %v244_v23, 2  ;;  %s579_s29 = scalar_lea.hbm %s578_s20, 36  ;;  %s583_s3 = scalar_lea.hbm %s835_s2, 72 }
  0x30   : > { %v286_v33 = vadd.f32 %v272_v29, %v223_v21  ;;  %v273_v35 = vsel %vm264_vm0, %v241_v13, %v257_v27  ;;  %v245_v36 = vperm.slane %v228_v5, 4  ;;  %v246_v37 = vperm.slane %v228_v5, 5  ;;  %p580_p4 = scmp.ne.s32.totalorder %s578_s20, %s579_s29  ;;  %p584_p7 = scmp.lt.s32.totalorder %s578_s20, %s835_s2 }
  0x31   : > { %290 = vst [vmem:[%s218_s7] sm:$0xff] %v285_v28  ;;  %v274_v38 = vsel %vm266_vm1, %v258_v30, %v259_v31  ;;  %v247_v39 = vperm.slane %v228_v5, 6  ;;  %v248_v40 = vperm.slane %v228_v5, 7  ;;  %v249_v43 = vperm.slane %v229_v32, 0  ;;  %p585_p8 = scmp.lt.s32.totalorder %s583_s3, %s579_s29 }
  0x32   : > { %291 = vst [vmem:[%s218_s7 + $0x8] sm:$0xff] %v286_v33  ;;  %v275_v41 = vsel %vm268_vm2, %v273_v35, %v274_v38  ;;  %v260_v42 = vrot.slane %v246_v37, 6  ;;  %v250_v44 = vperm.slane %v229_v32, 1  ;;  %p581_p5 = pnand %p580_p4, %p717_p9 }
  0x33   : > { %v287_v45 = vadd.f32 %v275_v41, %v224_v34  ;;  %v261_v46 = vrot.slane %v247_v39, 4  ;;  %v262_v47 = vrot.slane %v248_v40, 2  ;;  %p586_p10 = por %p585_p8, %p584_p7 }
  0x34   : > { %v276_v49 = vsel %vm264_vm0, %v245_v36, %v260_v42  ;;  %v263_v51 = vrot.slane %v250_v44, 6  ;;  %p582_p6 = pneg %p581_p5 }
  0x35   : > { %292 = vst [vmem:[%s218_s7 + $0x10] sm:$0xff] %v287_v45  ;;  %v277_v52 = vsel %vm266_vm1, %v261_v46, %v262_v47 }
  0x36   : > { %v278_v53 = vsel %vm268_vm2, %v276_v49, %v277_v52  ;;  %v279_v54 = vsel %vm264_vm0, %v249_v43, %v263_v51  ;;  %p587_p13 = pnand %p586_p10, %p582_p6 }
  0x37   : > { %v288_v55 = vadd.f32 %v278_v53, %v225_v48  ;;  %v289_v56 = vadd.f32 %v279_v54, %v226_v50 }
  0x39   : > { %293 = vst [vmem:[%s218_s7 + $0x18] sm:$0xff] %v288_v55 }
  0x3a   : > { %294 = vst [vmem:[%s218_s7 + $0x20] sm:$0xf] %v289_v56 }
  0x3b   : > { %590 = shalt.err (!%p587_p13)
}
  0x3c   : > { %440 = dma.vmem_to_hbm [thread:$0]  (%p717_p9), %s312_s16, 576, %s314_s18, %s296_s19  }
  0x3d PF: > { %s325_s30 = sand.u32 1, %s629_s9   ;;  %p450_p0 = pnand %p424_p12, %p724_p11 }
  0x3e   : > { %s326_s25 = scalar_lea.sflag [#allocation4], %s325_s30 }
  0x3f   : > { %p451_p1 = pneg %p450_p0 }
  0x41   : > { %624 = dma.done.wait (%p451_p1), %s326_s25, 576  }
  0x42   : > { %626 = vsyncadd (%p451_p1), %s326_s25, 4294966720  ;;  %s21_s14 = sadd.s32 1, %s649_s14   ;;  %s841_s9 = smov %s633_s10 }
  0x43   : > { %p18_p2 = scmp.ge.s32.totalorder %s21_s14, 4   ;;  %s842_s10 = smov %s637_s11 }
  0x44   : > { %s843_s11 = smov %s722_s23  ;;  %s844_s12 = smov %s645_s13 }
  0x45   : > { %s845_s13 = smov %s847_s17  ;;  %20 = sbr.rel (!%p18_p2) target bundleno = 8 (0x8), region = 86 }
  0x4a   :  { %332 = vsyncpa [#allocation3], 1 }
  0x4b   :  { %334 = vsyncpa [#allocation3 + $0x1], 1 }
  0x4c   :  { %335 = vsyncpa [#allocation6], 1 }
  0x4d   :  { %337 = vsyncpa [#allocation6 + $0x1], 1 }
  0x4e   :  { %338 = vsyncpa [#allocation4], 1 }
  0x4f   :  { %340 = vsyncpa [#allocation4 + $0x1], 1 }

</bundles_post_ra>
